<compile_context>
chip_gen: v5e
topology: v5e:2x2
jax: 0.10.0
libtpu: 0.0.40
codegen_flags: <defaults>
</compile_context>

<pallas_src>
import jax
import jax.numpy as jnp
from jax import lax
from jax.experimental import pallas as pl
from jax.experimental.pallas import tpu as pltpu

LN_EPS = 1e-5  # torch.nn.LayerNorm default


def _round_up(x, m):
    return ((x + m - 1) // m) * m


def _decoder_kernel(x_ref, gamma_ref, beta_ref, w_ref, bias_ref, o_ref):
    # x_ref:     (tB, D)   CLS-token features for this batch tile
    # gamma_ref: (1, D)    LayerNorm weight
    # beta_ref:  (1, D)    LayerNorm bias
    # w_ref:     (tC, D)   Linear weight tile, torch (out, in) layout
    # bias_ref:  (1, tC)   Linear bias tile
    # o_ref:     (tB, tC)  logits tile
    x = x_ref[...].astype(jnp.float32)

    # LayerNorm over the last dim (biased variance, eps inside rsqrt),
    # matching torch.nn.LayerNorm.
    mean = jnp.mean(x, axis=-1, keepdims=True)
    centered = x - mean
    var = jnp.mean(centered * centered, axis=-1, keepdims=True)
    xn = centered * lax.rsqrt(var + LN_EPS)
    y = xn * gamma_ref[...].astype(jnp.float32) + beta_ref[...].astype(jnp.float32)

    # Linear: contract D of y (tB, D) with D of w (tC, D) -> (tB, tC).
    # Operands go to the MXU in the weight's native dtype; accumulate in f32.
    w = w_ref[...]
    logits = lax.dot_general(
        y.astype(w.dtype), w,
        dimension_numbers=(((1,), (1,)), ((), ())),
        preferred_element_type=jnp.float32)
    logits = logits + bias_ref[...].astype(jnp.float32)

    o_ref[...] = logits.astype(o_ref.dtype)


def classification_decoder(x, gamma, beta, weight, bias):
    """x: (B, N, D). weight: (C, D) torch layout. Returns f32 logits (B, C)."""
    B, N, D = x.shape
    C = weight.shape[0]

    # Tile sizes: sublane-aligned batch tile, lane-aligned class tile.
    tB = min(128, _round_up(B, 8))
    tC = min(512, _round_up(C, 128))
    Bp = _round_up(B, tB)
    Cp = _round_up(C, tC)

    # CLS-token slice (tiny strided copy, ~B*D elements — negligible next to
    # the weight stream). Kept in the wrapper so the kernel's batch tile keeps
    # an (8,128)-compliant block shape.
    # TODO(synk): fold the CLS slice into the x BlockSpec (size-1 second-minor
    # block on the full (B,N,D) array) once that layout is guaranteed to lower.
    x_cls = x[:, 0, :]                                       # (B, D)
    if Bp != B:
        x_cls = jnp.pad(x_cls, ((0, Bp - B), (0, 0)))
    w_p = weight if Cp == C else jnp.pad(weight, ((0, Cp - C), (0, 0)))
    bias_p = bias if Cp == C else jnp.pad(bias, (0, Cp - C))

    gamma2 = gamma.reshape(1, D)
    beta2 = beta.reshape(1, D)
    bias2 = bias_p.reshape(1, Cp)

    grid = (Bp // tB, Cp // tC)

    cost = pl.CostEstimate(
        flops=2 * Bp * D * Cp + 6 * Bp * D,
        transcendentals=0,
        bytes_accessed=(Bp * D * x_cls.dtype.itemsize
                        + Cp * D * w_p.dtype.itemsize
                        + Cp * bias2.dtype.itemsize
                        + 2 * D * 4
                        + Bp * Cp * 4),
    )

    out = pl.pallas_call(
        _decoder_kernel,
        out_shape=jax.ShapeDtypeStruct((Bp, Cp), jnp.float32),
        grid_spec=pltpu.PrefetchScalarGridSpec(
            num_scalar_prefetch=0,
            grid=grid,
            in_specs=[
                pl.BlockSpec((tB, D), lambda i, j: (i, 0)),   # x_cls
                pl.BlockSpec((1, D), lambda i, j: (0, 0)),    # gamma
                pl.BlockSpec((1, D), lambda i, j: (0, 0)),    # beta
                pl.BlockSpec((tC, D), lambda i, j: (j, 0)),   # weight (C, D)
                pl.BlockSpec((1, tC), lambda i, j: (0, j)),   # bias
            ],
            out_specs=pl.BlockSpec((tB, tC), lambda i, j: (i, j)),
        ),
        compiler_params=pltpu.CompilerParams(
            dimension_semantics=("parallel", "parallel"),
            vmem_limit_bytes=32 * 1024 * 1024,   # safe on v7x's smaller VMEM
        ),
        cost_estimate=cost,
    )(x_cls, gamma2, beta2, w_p, bias2)

    # Drop batch/class padding.
    return out[:B, :C]


def _reference(x, gamma, beta, weight, bias):
    x_cls = x[:, 0, :]
    mean = jnp.mean(x_cls, axis=-1, keepdims=True)
    var = jnp.mean((x_cls - mean) ** 2, axis=-1, keepdims=True)
    xn = (x_cls - mean) / jnp.sqrt(var + LN_EPS)
    y = xn * gamma + beta
    return y @ weight.T + bias


if __name__ == "__main__":
    # Small shapes consistent with the module: batch=2, seq=8, dim=32,
    # num_classes=16 (wrapper pads batch->8 and classes->128 internally).
    B, N, D, C = 2, 8, 32, 16

    key = jax.random.PRNGKey(0)
    kx, kg, kb, kw, kbi = jax.random.split(key, 5)

    x = jax.random.normal(kx, (B, N, D), dtype=jnp.float32)
    gamma = 1.0 + 0.1 * jax.random.normal(kg, (D,), dtype=jnp.float32)
    beta = 0.1 * jax.random.normal(kb, (D,), dtype=jnp.float32)
    weight = jax.random.normal(kw, (C, D), dtype=jnp.float32) / jnp.sqrt(D)
    bias = 0.1 * jax.random.normal(kbi, (C,), dtype=jnp.float32)

    out = classification_decoder(x, gamma, beta, weight, bias)
    out = jax.block_until_ready(out)

    ref = _reference(x, gamma, beta, weight, bias)
    assert out.shape == (B, C), out.shape
    assert jnp.allclose(out, ref, atol=1e-4, rtol=1e-4), (
        float(jnp.max(jnp.abs(out - ref))))

    print("KERNEL_OK")
</pallas_src>

<mosaic_0001>
module attributes {stable_mosaic.version = 11 : i64} {
  func.func @_decoder_kernel(%arg0: i32, %arg1: i32, %arg2: memref<8x32xf32, #tpu.memory_space<vmem>>, %arg3: memref<1x32xf32, #tpu.memory_space<vmem>>, %arg4: memref<1x32xf32, #tpu.memory_space<vmem>>, %arg5: memref<128x32xf32, #tpu.memory_space<vmem>>, %arg6: memref<1x128xf32, #tpu.memory_space<vmem>>, %arg7: memref<8x128xf32, #tpu.memory_space<vmem>>) attributes {dimension_semantics = [#tpu.dimension_semantics<parallel>, #tpu.dimension_semantics<parallel>], iteration_bounds = array<i64: 1, 1>, scalar_prefetch = 0 : i64, scratch_operands = 0 : i64, tpu.core_type = #tpu.core_type<tc>, window_params = [{transform_indices = @transform_0, window_bounds = array<i64: 8, 32>}, {pipeline_mode = #tpu.pipeline_mode<synchronous>, transform_indices = @transform_1, window_bounds = array<i64: 1, 32>}, {pipeline_mode = #tpu.pipeline_mode<synchronous>, transform_indices = @transform_2, window_bounds = array<i64: 1, 32>}, {transform_indices = @transform_3, window_bounds = array<i64: 128, 32>}, {transform_indices = @transform_4, window_bounds = array<i64: 1, 128>}, {transform_indices = @transform_5, window_bounds = array<i64: 8, 128>}]} {
    %c0 = arith.constant 0 : index
    %c0_0 = arith.constant 0 : index
    %0 = vector.load %arg2[%c0, %c0_0] : memref<8x32xf32, #tpu.memory_space<vmem>>, vector<8x32xf32>
    %cst = arith.constant dense<0.000000e+00> : vector<8xf32>
    %1 = vector.multi_reduction <add>, %0, %cst [1] : vector<8x32xf32> to vector<8xf32>
    %2 = vector.shape_cast %1 : vector<8xf32> to vector<8x1xf32>
    %cst_1 = arith.constant 3.200000e+01 : f32
    %3 = vector.broadcast %cst_1 : f32 to vector<8x1xf32>
    %4 = arith.divf %2, %3 : vector<8x1xf32>
    %5 = vector.broadcast %4 : vector<8x1xf32> to vector<8x32xf32>
    %6 = arith.subf %0, %5 : vector<8x32xf32>
    %7 = arith.mulf %6, %6 : vector<8x32xf32>
    %cst_2 = arith.constant dense<0.000000e+00> : vector<8xf32>
    %8 = vector.multi_reduction <add>, %7, %cst_2 [1] : vector<8x32xf32> to vector<8xf32>
    %9 = vector.shape_cast %8 : vector<8xf32> to vector<8x1xf32>
    %cst_3 = arith.constant 3.200000e+01 : f32
    %10 = vector.broadcast %cst_3 : f32 to vector<8x1xf32>
    %11 = arith.divf %9, %10 : vector<8x1xf32>
    %cst_4 = arith.constant 9.99999974E-6 : f32
    %12 = vector.broadcast %cst_4 : f32 to vector<8x1xf32>
    %13 = arith.addf %11, %12 : vector<8x1xf32>
    %14 = math.rsqrt %13 : vector<8x1xf32>
    %15 = vector.broadcast %14 : vector<8x1xf32> to vector<8x32xf32>
    %16 = arith.mulf %6, %15 : vector<8x32xf32>
    %c0_5 = arith.constant 0 : index
    %c0_6 = arith.constant 0 : index
    %17 = vector.load %arg3[%c0_5, %c0_6] : memref<1x32xf32, #tpu.memory_space<vmem>>, vector<1x32xf32>
    %18 = vector.broadcast %17 : vector<1x32xf32> to vector<8x32xf32>
    %19 = arith.mulf %16, %18 : vector<8x32xf32>
    %c0_7 = arith.constant 0 : index
    %c0_8 = arith.constant 0 : index
    %20 = vector.load %arg4[%c0_7, %c0_8] : memref<1x32xf32, #tpu.memory_space<vmem>>, vector<1x32xf32>
    %21 = vector.broadcast %20 : vector<1x32xf32> to vector<8x32xf32>
    %22 = arith.addf %19, %21 : vector<8x32xf32>
    %c0_9 = arith.constant 0 : index
    %c0_10 = arith.constant 0 : index
    %23 = vector.load %arg5[%c0_9, %c0_10] : memref<128x32xf32, #tpu.memory_space<vmem>>, vector<128x32xf32>
    %cst_11 = arith.constant dense<0.000000e+00> : vector<8x128xf32>
    %24 = tpu.matmul %22, %23, %cst_11 {dimension_numbers = #tpu.dot_dimension_numbers<[1], [1], [0], [0], [0, 0, 1, 0], [], []>} : vector<8x32xf32>, vector<128x32xf32>, vector<8x128xf32> -> vector<8x128xf32>
    %c0_12 = arith.constant 0 : index
    %c0_13 = arith.constant 0 : index
    %25 = vector.load %arg6[%c0_12, %c0_13] : memref<1x128xf32, #tpu.memory_space<vmem>>, vector<1x128xf32>
    %26 = vector.broadcast %25 : vector<1x128xf32> to vector<8x128xf32>
    %27 = arith.addf %24, %26 : vector<8x128xf32>
    %c0_14 = arith.constant 0 : index
    %c0_15 = arith.constant 0 : index
    %28 = vector.load %arg7[%c0_14, %c0_15] : memref<8x128xf32, #tpu.memory_space<vmem>>, vector<8x128xf32>
    tpu.vector_store %arg7[%c0_14, %c0_15], %27 {strides = array<i32>} : memref<8x128xf32, #tpu.memory_space<vmem>>, vector<8x128xf32>,
    return
  }
  func.func @transform_0(%arg0: i32, %arg1: i32) -> (i32, i32) {
    %c0_i32 = arith.constant 0 : i32
    %c0_i32_0 = arith.constant 0 : i32
    return %arg0, %c0_i32 : i32, i32
  }
  func.func @transform_1(%arg0: i32, %arg1: i32) -> (i32, i32) {
    %c0_i32 = arith.constant 0 : i32
    %c0_i32_0 = arith.constant 0 : i32
    %c0_i32_1 = arith.constant 0 : i32
    return %c0_i32, %c0_i32_0 : i32, i32
  }
  func.func @transform_2(%arg0: i32, %arg1: i32) -> (i32, i32) {
    %c0_i32 = arith.constant 0 : i32
    %c0_i32_0 = arith.constant 0 : i32
    %c0_i32_1 = arith.constant 0 : i32
    return %c0_i32, %c0_i32_0 : i32, i32
  }
  func.func @transform_3(%arg0: i32, %arg1: i32) -> (i32, i32) {
    %c0_i32 = arith.constant 0 : i32
    %c0_i32_0 = arith.constant 0 : i32
    return %arg1, %c0_i32 : i32, i32
  }
  func.func @transform_4(%arg0: i32, %arg1: i32) -> (i32, i32) {
    %c0_i32 = arith.constant 0 : i32
    %c0_i32_0 = arith.constant 0 : i32
    return %c0_i32, %arg1 : i32, i32
  }
  func.func @transform_5(%arg0: i32, %arg1: i32) -> (i32, i32) {
    %c0_i32 = arith.constant 0 : i32
    return %arg0, %arg1 : i32, i32
  }
}

</mosaic_0001>

<bundles_post_ra>
// kernel: tpu_custom_call.1
= control target key start
LH: loop header
LB: loop body
LE: loop exit
PB: predicated region body
PF: predicated region fallthrough
CT: control target
= control target key end

     0   :  { %vm22_vm0 = vcmask 261120   ;;  %s336_s0 = inlined_call_operand.vmem [shape: f32[8,32], index: 0, kind: input, shape index: {}]   ;;  %s337_s1 = inlined_call_operand.vmem [shape: f32[1,32], index: 1, kind: input, shape index: {}]   ;;  %s338_s2 = inlined_call_operand.vmem [shape: f32[1,32], index: 2, kind: input, shape index: {}]   ;;  %s339_s3 = inlined_call_operand.vmem [shape: f32[128,32], index: 3, kind: input, shape index: {}]   ;;  %s340_s4 = inlined_call_operand.vmem [shape: f32[1,128], index: 4, kind: input, shape index: {}]   ;;  %s341_s5 = inlined_call_operand.hbm [shape: f32[8,128], index: 5, kind: output, shape index: {}]  }
   0x1   :  { %v21_v0 = vld [vmem:[%s336_s0] sm:$0xff] }
   0x2   :  { %v23_v1 = vsel %vm22_vm0, %v21_v0, 0.0 }
   0x3   :  { %24 = vadd.xlane.f32.xlu0 %v23_v1 }
   0x4   :  { %10 = vsyncpa [#allocation3], 0  ;;  %v222_v2 = vmov 32.0   ;;  %v77_v3 = vld [vmem:[%s339_s3 + $0x78] sm:$0xff]  ;;  %v76_v4 = vld [vmem:[%s339_s3 + $0x70] sm:$0xff]  ;;  %s223_s30 = smov [#allocation2]  }
   0x5   :  { %192 = vrcp.f32 %v222_v2  ;;  %170 = vmatpush.xpose.msk.msra.mxu0 %vm22_vm0, %v77_v3  ;;  %v75_v7 = vld [vmem:[%s339_s3 + $0x68] sm:$0xff]  ;;  %v74_v9 = vld [vmem:[%s339_s3 + $0x60] sm:$0xff]  ;;  %v73_v11 = vld [vmem:[%s339_s3 + $0x58] sm:$0xff]  ;;  %s159_s6 = sshll.u32 %s223_s30, 4  ;;  %s160_s6 = int_to_ptr.vmem [resolvable:$true] %s159_s6 }
   0x6   :  { %v72_v13 = vld [vmem:[%s339_s3 + $0x50] sm:$0xff]  ;;  %v71_v15 = vld [vmem:[%s339_s3 + $0x48] sm:$0xff]  ;;  %v70_v18 = vld [vmem:[%s339_s3 + $0x40] sm:$0xff] }
   0x7   :  { %v69_v21 = vld [vmem:[%s339_s3 + $0x38] sm:$0xff]  ;;  %v68_v23 = vld [vmem:[%s339_s3 + $0x30] sm:$0xff]  ;;  %v67_v24 = vld [vmem:[%s339_s3 + $0x28] sm:$0xff] }
   0x8   :  { %v66_v25 = vld [vmem:[%s339_s3 + $0x20] sm:$0xff]  ;;  %v65_v26 = vld [vmem:[%s339_s3 + $0x18] sm:$0xff]  ;;  %v64_v27 = vld [vmem:[%s339_s3 + $0x10] sm:$0xff] }
   0x9   :  { %171 = vmatpush.xpose.msk.msra.mxu0 %vm22_vm0, %v76_v4  ;;  %v63_v28 = vld [vmem:[%s339_s3 + $0x8] sm:$0xff]  ;;  %v62_v29 = vld [vmem:[%s339_s3] sm:$0xff] }
   0xa   :  { %v189_v39 = vld [vmem:[%s337_s1] ss:$0 sm:$0xff]  ;;  %s161_s1 = sshll.u32 %s341_s5, 4  ;;  %s162_s1 = int_to_ptr.hbm [resolvable:$true] %s161_s1 }
   0xb   :  { %v193_v5 = vpop.eup %192  ;;  %v190_v42 = vld [vmem:[%s338_s2] ss:$0 sm:$0xff] }
   0xc   :  { %v27_v6 = vmul.f32 32.0, %v193_v5  ;;  %vm31_vm1 = vweird.f32 %v193_v5  ;;  %v191_v45 = vld [vmem:[%s340_s4] ss:$0 sm:$0xff] }
   0xd   :  { %172 = vmatpush.xpose.msk.msra.mxu0 %vm22_vm0, %v75_v7 }
   0xe   :  { %v28_v8 = vsub.f32 1.0, %v27_v6 }
  0x10   :  { %v29_v10 = vmul.f32 %v193_v5, %v28_v8 }
  0x11   :  { %173 = vmatpush.xpose.msk.msra.mxu0 %vm22_vm0, %v74_v9 }
  0x12   :  { %v30_v12 = vadd.f32 %v193_v5, %v29_v10 }
  0x14   :  { %v32_v14 = vsel %vm31_vm1, %v193_v5, %v30_v12 }
  0x15   :  { %174 = vmatpush.xpose.msk.msra.mxu0 %vm22_vm0, %v73_v11 }
  0x19   :  { %175 = vmatpush.xpose.msk.msra.mxu0 %vm22_vm0, %v72_v13 }
  0x1d   :  { %176 = vmatpush.xpose.msk.msra.mxu0 %vm22_vm0, %v71_v15 }
  0x21   :  { %177 = vmatpush.xpose.msk.msra.mxu0 %vm22_vm0, %v70_v18 }
  0x25   :  { %178 = vmatpush.xpose.msk.msra.mxu0 %vm22_vm0, %v69_v21 }
  0x29   :  { %179 = vmatpush.xpose.msk.msra.mxu0 %vm22_vm0, %v68_v23 }
  0x2d   :  { %180 = vmatpush.xpose.msk.msra.mxu0 %vm22_vm0, %v67_v24 }
  0x31   :  { %181 = vmatpush.xpose.msk.msra.mxu0 %vm22_vm0, %v66_v25 }
  0x35   :  { %182 = vmatpush.xpose.msk.msra.mxu0 %vm22_vm0, %v65_v26 }
  0x39   :  { %183 = vmatpush.xpose.msk.msra.mxu0 %vm22_vm0, %v64_v27 }
  0x3d   :  { %184 = vmatpush.xpose.msk.msra.mxu0 %vm22_vm0, %v63_v28 }
  0x41   :  { %185 = vmatpush.xpose.msk.msra.mxu0 %vm22_vm0, %v62_v29 }
  0x76   :  { %v25_v16 = vpop.xlane.xlu0 %24 }
  0x77   :  { %v33_v17 = vmul.f32 %v32_v14, %v25_v16 }
  0x79   :  { %v34_v19 = vsub.f32 %v21_v0, %v33_v17 }
  0x7b   :  { %v35_v20 = vmul.f32 %v34_v19, %v34_v19 }
  0x7d   :  { %v36_v22 = vsel %vm22_vm0, %v35_v20, 0.0 }
  0x7e   :  { %37 = vadd.xlane.f32.xlu0 %v36_v22 }
  0xf1   :  { %v38_v30 = vpop.xlane.xlu0 %37 }
  0xf2   :  { %v39_v31 = vmul.f32 %v38_v30, %v32_v14 }
  0xf4   :  { %v40_v32 = vadd.f32 1e-05, %v39_v31 }
  0xf6   :  { %194 = vrsqrt.f32 %v40_v32  ;;  %vm47_vm3 = vweird.f32 %v40_v32 }
  0xfc   :  { %v195_v33 = vpop.eup %194 }
  0xfd   :  { %v42_v34 = vmul.f32 %v195_v33, %v40_v32  ;;  %vm48_vm2 = vweird.f32 %v195_v33 }
  0xfe   :  { %vm49_vm4 = vmor %vm47_vm3, %vm48_vm2 }
  0xff   :  { %v43_v35 = vmul.f32 %v195_v33, %v42_v34 }
 0x101   :  { %v44_v36 = vmul.f32 0.5, %v43_v35 }
 0x103   :  { %v45_v37 = vsub.f32 1.5, %v44_v36 }
 0x105   :  { %v46_v38 = vmul.f32 %v195_v33, %v45_v37 }
 0x107   :  { %v50_v40 = vsel %vm49_vm4, %v195_v33, %v46_v38 }
 0x108   :  { %v51_v41 = vmul.f32 %v50_v40, %v34_v19 }
 0x10a   :  { %v56_v43 = vmul.f32 %v189_v39, %v51_v41 }
 0x10c   :  { %v61_v44 = vadd.f32 %v190_v42, %v56_v43 }
 0x10e   :  { %186 = vmatmul.msk.f32.vlgmr.msra.gmra.mxu0 %vm22_vm0, %v61_v44 }
 0x18b   :  { %v150_v46 = vpop.f32.mrf.mxu0 }
 0x18c   :  { %v151_v47 = vadd.f32 %v191_v45, %v150_v46 }
 0x18e   :  { %153 = vst [vmem:[#allocation2] sm:$0xff] %v151_v47 }
 0x18f   :  { %164 = dma.vmem_to_hbm [thread:$0]  %s160_s6, 128, %s162_s1, [#allocation3]  }
 0x190   :  { %220 = dma.done.wait [#allocation3], 128  }
 0x191   :  { %221 = vsyncadd [#allocation3], 4294967168 }
 0x192   :  { %169 = vsyncpa [#allocation3], 1 }

</bundles_post_ra>
